<compile_context>
chip_gen: v6e
topology: v6e:2x2x1
jax: 0.10.0
libtpu: 0.0.40
codegen_flags: <defaults>
</compile_context>

<pallas_src>
import functools

import jax
import jax.numpy as jnp
from jax.experimental import pallas as pl
from jax.experimental.pallas import tpu as pltpu

_LANE = 128
_MIB = 1024 * 1024


def _round_up(x, m):
    return ((x + m - 1) // m) * m


def _probe_buffered():
    """True if this jax version supports BlockSpec(pipeline_mode=pl.Buffered(n))."""
    try:
        pl.BlockSpec((8, 128), lambda i: (i, 0), pipeline_mode=pl.Buffered(3))
        return True
    except Exception:
        return False


_HAS_BUFFERED = _probe_buffered()


def _tpu_vmem_capacity_bytes():
    try:
        return getattr(pltpu.get_tpu_info(), "vmem_capacity_bytes", None)
    except Exception:
        return None


# --------------------------------------------------------------------------
# Kernel
# --------------------------------------------------------------------------
def pool_classify_kernel(h_ref, denom_ref, w_ref, b_ref, o_ref, acc_ref, *,
                         pool_on_mxu):
    """One (batch-tile, seq-tile) grid step: pooling accumulate + classifier.

    h_ref:     [tb, ts, H] hidden-state slab (native dtype, e.g. bf16)
    denom_ref: [tb, 1]     attention_mask.sum(axis=1), f32
    w_ref:     [H, dim]    classifier weight (pre-transposed), f32
    b_ref:     [1, dim]    classifier bias, f32
    o_ref:     [tb, dim]   output logits, f32
    acc_ref:   [tb, H]     f32 accumulator scratch (resident across seq axis)
    """
    s = pl.program_id(1)

    @pl.when(s == 0)
    def _init():
        acc_ref[...] = jnp.zeros_like(acc_ref)

    # NOTE: the PyTorch reference calls `masked_fill` out-of-place and DISCARDS
    # the result, so the numerator sums over ALL positions; only the
    # denominator uses the attention mask.  Reproduced faithfully here.
    h = h_ref[...]                                        # [tb, ts, H]
    if pool_on_mxu:
        # v7x: pool on the (idle) MXU so the f32-cast+add chain does not become
        # the VALU co-bottleneck at 3.2 TB/s.  seg[b, b*ts+s] = 1 (exact in
        # bf16), so seg @ h_flat == sum over seq, accumulated in f32.
        tb, ts, H = h.shape
        h_flat = h.reshape(tb * ts, H)                    # layout-preserving
        bid = jax.lax.broadcasted_iota(jnp.int32, (1, tb * ts), 1) // ts
        brow = jax.lax.broadcasted_iota(jnp.int32, (tb, 1), 0)
        seg = (bid == brow).astype(h.dtype)               # [tb, tb*ts]
        acc_ref[...] += jnp.dot(seg, h_flat,
                                preferred_element_type=jnp.float32)
    else:
        # v5e/v6e: plain VPU partial sum, hidden under the next slab's DMA.
        acc_ref[...] += jnp.sum(h.astype(jnp.float32), axis=1)

    @pl.when(s == pl.num_programs(1) - 1)
    def _finalize():
        # Precondition (same as the PyTorch module): no all-zero mask rows.
        emb = acc_ref[...] * pl.reciprocal(denom_ref[...])        # [tb, H]
        logits = jnp.dot(emb, w_ref[...],
                         preferred_element_type=jnp.float32)       # [tb, dim]
        o_ref[...] = logits + b_ref[...]


# --------------------------------------------------------------------------
# Tiling heuristics
# --------------------------------------------------------------------------
def _fixed_vmem_bytes(tb, H, dim):
    """Lane/sublane-padded bytes of the small resident buffers (x2 buffered)."""
    f32 = 4
    tbp = _round_up(max(tb, 1), 8)
    dimp = _round_up(dim, _LANE)
    fixed = 2 * _round_up(H, 8) * dimp * f32       # classifier weight
    fixed += 2 * 8 * dimp * f32                    # bias
    fixed += 2 * tbp * _LANE * f32                 # mask denominator
    fixed += 2 * tbp * dimp * f32                  # output logits
    fixed += tbp * _round_up(H, _LANE) * f32       # f32 accumulator scratch
    return fixed


def _pick_batch_tile(B, max_tb):
    """tb must be a multiple of 8 (sublane-legal for the [tb,*] blocks) or B.

    Prefers the largest multiple-of-8 divisor of B that still leaves >=2 batch
    grid steps (so both v7x TensorCores get work); falls back to tb = B.
    """
    best = None
    lim = min(max_tb, B // 2) if B >= 16 else 0
    t = 8
    while t <= lim:
        if B % t == 0:
            best = t
        t += 8
    return best if best is not None else B


def _pick_seq_tile(S, tb, H_padded, itemsize, budget_bytes):
    """Largest divisor of S (multiple of the dtype's sublane quantum) whose
    double-buffered [tb, ts, H] slab fits the VMEM budget."""
    quantum = 8 * max(1, 4 // itemsize)            # f32: 8, bf16: 16, int8: 32
    per_token = 2 * tb * H_padded * itemsize       # 2x for double buffering
    cap = budget_bytes // max(1, per_token)
    if S <= cap:
        return S
    cands = [t for t in range(quantum, S, quantum) if S % t == 0]
    if not cands:
        return S                                   # ragged S: full extent only
    fitting = [t for t in cands if t <= cap]
    return max(fitting) if fitting else min(cands)


# --------------------------------------------------------------------------
# Wrapper
# --------------------------------------------------------------------------
def text_classification_head(last_hidden_state, mask_denom, w_t, bias, *,
                             seq_tile=None, batch_tile=None,
                             vmem_limit_bytes=None, pool_on_mxu=None):
    """Tiled average pooling + linear classifier.

    last_hidden_state: [B, S, H] (native dtype; cast to f32 happens in-kernel)
    mask_denom:        [B, 1] f32 = attention_mask.sum(axis=1)
    w_t:               [H, dim] f32 classifier weight (pre-transposed)
    bias:              [1, dim] f32
    returns            [B, dim] f32 logits
    """
    B, S, H = last_hidden_state.shape
    dim = w_t.shape[1]
    itemsize = jnp.dtype(last_hidden_state.dtype).itemsize
    quantum = 8 * max(1, 4 // itemsize)
    Hp = _round_up(H, _LANE)

    # Per-generation VMEM limit: ~3/4 of physical (96 MiB on v5e/v6e's 128 MiB,
    # 48 MiB on v7x's 64 MiB); conservative 48 MiB if detection fails.
    vmem_cap = _tpu_vmem_capacity_bytes()
    if vmem_limit_bytes is None:
        vmem_limit_bytes = (48 * _MIB if not vmem_cap
                            else min((vmem_cap * 3) // 4, 100 * _MIB))
    if pool_on_mxu is None:
        # Small-VMEM chips (v7x) are the ones whose HBM rate makes the VPU the
        # co-bottleneck for the cast+add pooling; put the reduction on the MXU.
        pool_on_mxu = bool(vmem_cap) and vmem_cap <= 64 * _MIB

    # Batch tile (VMEM-aware so even the minimum seq tile still fits).
    rough_budget = max(_MIB, vmem_limit_bytes - 8 * _MIB)
    max_tb_by_vmem = max(1, rough_budget // (2 * quantum * Hp * itemsize))
    tb = batch_tile if batch_tile is not None else _pick_batch_tile(
        B, max_tb=min(128, max_tb_by_vmem))
    assert B % tb == 0, (B, tb)

    # Seq tile from the real budget (limit minus fixed buffers minus headroom).
    fixed = _fixed_vmem_bytes(tb, H, dim)
    headroom = 4 * _MIB + (6 * _MIB if pool_on_mxu else 0)
    budget = max(0, vmem_limit_bytes - fixed - headroom)
    ts = seq_tile if seq_tile is not None else _pick_seq_tile(
        S, tb, Hp, itemsize, budget)
    assert S % ts == 0, (S, ts)

    # MXU-pooling guards: the [tb,ts,H]->[tb*ts,H] reshape must be
    # layout-preserving and the segment matrix must stay small.
    if pool_on_mxu and (ts % quantum != 0 or tb * tb * ts > (1 << 20)):
        pool_on_mxu = False

    n_b, n_s = B // tb, S // ts

    # Hidden-slab spec; small tiles with several seq steps get a 3rd buffer to
    # hide DMA-issue latency (~0.35 us per grid step).
    slab_bytes = tb * ts * Hp * itemsize
    if _HAS_BUFFERED and n_s >= 3 and slab_bytes <= _MIB:
        h_spec = pl.BlockSpec((tb, ts, H), lambda i, s: (i, s, 0),
                              pipeline_mode=pl.Buffered(3))
    else:
        h_spec = pl.BlockSpec((tb, ts, H), lambda i, s: (i, s, 0))

    kernel = functools.partial(pool_classify_kernel, pool_on_mxu=pool_on_mxu)

    return pl.pallas_call(
        kernel,
        out_shape=jax.ShapeDtypeStruct((B, dim), jnp.float32),
        grid_spec=pltpu.PrefetchScalarGridSpec(
            num_scalar_prefetch=0,
            grid=(n_b, n_s),
            in_specs=[
                h_spec,                                             # hidden slab
                pl.BlockSpec((tb, 1), lambda i, s: (i, 0)),         # mask denom
                pl.BlockSpec((H, dim), lambda i, s: (0, 0)),        # weight
                pl.BlockSpec((1, dim), lambda i, s: (0, 0)),        # bias
            ],
            out_specs=pl.BlockSpec((tb, dim), lambda i, s: (i, 0)),
            scratch_shapes=[pltpu.VMEM((tb, H), jnp.float32)],
        ),
        compiler_params=pltpu.CompilerParams(
            dimension_semantics=("parallel", "arbitrary"),
            vmem_limit_bytes=int(vmem_limit_bytes),
        ),
    )(last_hidden_state, mask_denom, w_t, bias)


def forward(encoded_batch, params, *, seq_tile=None, pool_on_mxu=None,
            vmem_limit_bytes=None):
    """Full TextClassificationModel.forward (synthetic backbone)."""
    input_ids = encoded_batch["input_ids"]              # [B, S] int32
    attention_mask = encoded_batch["attention_mask"]    # [B, S]

    # TODO(synk): the HF AutoModel transformer backbone (+ LoRA adapters,
    # tokenizer) is not translatable; a deterministic bf16 embedding lookup
    # stands in for the model producing last_hidden_state.  (For this synthetic
    # path the gather could also be fused into the kernel via scalar-prefetched
    # input_ids, but that is moot once a real backbone produces the states.)
    last_hidden_state = params["embed_table"][input_ids]   # [B, S, H] bf16

    # Tiny [B]-sized reduction kept outside the kernel so only the [B, S, H]
    # hidden states are streamed through the pipeline.
    mask_denom = attention_mask.astype(jnp.float32).sum(axis=1, keepdims=True)

    return text_classification_head(
        last_hidden_state, mask_denom, params["w_t"], params["bias"],
        seq_tile=seq_tile, pool_on_mxu=pool_on_mxu,
        vmem_limit_bytes=vmem_limit_bytes)


if __name__ == "__main__":
    # Small shapes consistent with the module's forward.
    B, S, H, VOCAB, DIM = 2, 64, 32, 50, 2

    key = jax.random.PRNGKey(0)
    k_emb, k_ids, k_w, k_b = jax.random.split(key, 4)

    # Deterministic synthetic parameters (backbone output kept in bf16).
    embed_table = (jax.random.normal(k_emb, (VOCAB, H), dtype=jnp.float32)
                   * 0.02).astype(jnp.bfloat16)
    # nn.Linear(embedding_dim, 2): weight [2, H], bias [2]; pre-transpose weight.
    w = jax.random.normal(k_w, (DIM, H), dtype=jnp.float32) * 0.1
    bias = jax.random.normal(k_b, (DIM,), dtype=jnp.float32) * 0.1
    params = {
        "embed_table": embed_table,
        "w_t": w.T,                      # [H, DIM]
        "bias": bias.reshape(1, DIM),    # [1, DIM]
    }

    # Deterministic synthetic encoded_batch (input_ids + padded attention mask).
    input_ids = jax.random.randint(k_ids, (B, S), 0, VOCAB, dtype=jnp.int32)
    valid_lens = jnp.array([[S], [S - 8]], dtype=jnp.int32)        # row 1 padded
    attention_mask = (jnp.arange(S, dtype=jnp.int32)[None, :] < valid_lens
                      ).astype(jnp.int32)                          # [B, S]
    encoded_batch = {"input_ids": input_ids, "attention_mask": attention_mask}

    # Pure-JAX reference (same "unmasked numerator" semantics as PyTorch code).
    h_f32 = embed_table[input_ids].astype(jnp.float32)
    denom = attention_mask.astype(jnp.float32).sum(axis=1, keepdims=True)
    ref = (h_f32.sum(axis=1) / denom) @ w.T + bias

    def check(out, name):
        assert out.shape == (B, DIM), (name, out.shape)
        assert jnp.allclose(out, ref, atol=1e-4, rtol=1e-4), (name, out, ref)

    # 1) fully automatic config (chip-dependent VMEM limit / pooling unit).
    check(jax.block_until_ready(forward(encoded_batch, params)), "auto")
    # 2) multi-seq-tile VPU accumulation path (v5e/v6e default).
    check(jax.block_until_ready(
        forward(encoded_batch, params, seq_tile=32, pool_on_mxu=False)),
        "vpu_tiled")
    # 3) MXU pooling path (v7x default; forced here so it is exercised anywhere).
    check(jax.block_until_ready(
        forward(encoded_batch, params, seq_tile=32, pool_on_mxu=True)),
        "mxu_tiled")
    # 4) small tiles, >=3 seq steps -> exercises the 3-deep pipeline buffering.
    check(jax.block_until_ready(
        forward(encoded_batch, params, seq_tile=16, pool_on_mxu=False)),
        "buffered")

    print("KERNEL_OK")
</pallas_src>

<mosaic_0001>
module attributes {stable_mosaic.version = 11 : i64} {
  func.func @pool_classify_kernel(%arg0: i32, %arg1: i32, %arg2: memref<2x64x32xbf16, #tpu.memory_space<vmem>>, %arg3: memref<2x1xf32, #tpu.memory_space<vmem>>, %arg4: memref<32x2xf32, #tpu.memory_space<vmem>>, %arg5: memref<1x2xf32, #tpu.memory_space<vmem>>, %arg6: memref<2x2xf32, #tpu.memory_space<vmem>>, %arg7: memref<2x32xf32, #tpu.memory_space<vmem>>) attributes {dimension_semantics = [#tpu.dimension_semantics<parallel>, #tpu.dimension_semantics<arbitrary>], iteration_bounds = array<i64: 1, 1>, scalar_prefetch = 0 : i64, scratch_operands = 1 : i64, tpu.core_type = #tpu.core_type<tc>, window_params = [{transform_indices = @transform_0, window_bounds = array<i64: 2, 64, 32>}, {transform_indices = @transform_1, window_bounds = array<i64: 2, 1>}, {pipeline_mode = #tpu.pipeline_mode<synchronous>, transform_indices = @transform_2, window_bounds = array<i64: 32, 2>}, {pipeline_mode = #tpu.pipeline_mode<synchronous>, transform_indices = @transform_3, window_bounds = array<i64: 1, 2>}, {transform_indices = @transform_4, window_bounds = array<i64: 2, 2>}]} {
    %c0_i32 = arith.constant 0 : i32
    %0 = arith.cmpi eq, %arg1, %c0_i32 : i32
    %1 = arith.extui %0 : i1 to i32
    %c0_i32_0 = arith.constant 0 : i32
    %2 = arith.cmpi ne, %1, %c0_i32_0 : i32
    scf.if %2 {
      %cst_9 = arith.constant 0.000000e+00 : f32
      %12 = vector.broadcast %cst_9 : f32 to vector<2x32xf32>
      %c0_10 = arith.constant 0 : index
      %c0_11 = arith.constant 0 : index
      %13 = vector.load %arg7[%c0_10, %c0_11] : memref<2x32xf32, #tpu.memory_space<vmem>>, vector<2x32xf32>
      tpu.vector_store %arg7[%c0_10, %c0_11], %12 {strides = array<i32>} : memref<2x32xf32, #tpu.memory_space<vmem>>, vector<2x32xf32>,
    } else {
    }
    %c0 = arith.constant 0 : index
    %c0_1 = arith.constant 0 : index
    %c0_2 = arith.constant 0 : index
    %3 = vector.load %arg2[%c0, %c0_1, %c0_2] : memref<2x64x32xbf16, #tpu.memory_space<vmem>>, vector<2x64x32xbf16>
    %c0_3 = arith.constant 0 : index
    %c0_4 = arith.constant 0 : index
    %4 = vector.load %arg7[%c0_3, %c0_4] : memref<2x32xf32, #tpu.memory_space<vmem>>, vector<2x32xf32>
    %5 = arith.extf %3 : vector<2x64x32xbf16> to vector<2x64x32xf32>
    %cst = arith.constant dense<0.000000e+00> : vector<2x32xf32>
    %6 = vector.multi_reduction <add>, %5, %cst [1] : vector<2x64x32xf32> to vector<2x32xf32>
    %7 = arith.addf %4, %6 : vector<2x32xf32>
    %c0_5 = arith.constant 0 : index
    %c0_6 = arith.constant 0 : index
    %8 = vector.load %arg7[%c0_5, %c0_6] : memref<2x32xf32, #tpu.memory_space<vmem>>, vector<2x32xf32>
    tpu.vector_store %arg7[%c0_5, %c0_6], %7 {strides = array<i32>} : memref<2x32xf32, #tpu.memory_space<vmem>>, vector<2x32xf32>,
    %c0_i32_7 = arith.constant 0 : i32
    %9 = arith.cmpi eq, %arg1, %c0_i32_7 : i32
    %10 = arith.extui %9 : i1 to i32
    %c0_i32_8 = arith.constant 0 : i32
    %11 = arith.cmpi ne, %10, %c0_i32_8 : i32
    scf.if %11 {
      %c0_9 = arith.constant 0 : index
      %c0_10 = arith.constant 0 : index
      %12 = vector.load %arg7[%c0_9, %c0_10] : memref<2x32xf32, #tpu.memory_space<vmem>>, vector<2x32xf32>
      %c0_11 = arith.constant 0 : index
      %c0_12 = arith.constant 0 : index
      %13 = vector.load %arg3[%c0_11, %c0_12] : memref<2x1xf32, #tpu.memory_space<vmem>>, vector<2x1xf32>
      %14 = tpu.reciprocal %13 : vector<2x1xf32> -> vector<2x1xf32>
      %15 = vector.broadcast %14 : vector<2x1xf32> to vector<2x32xf32>
      %16 = arith.mulf %12, %15 : vector<2x32xf32>
      %c0_13 = arith.constant 0 : index
      %c0_14 = arith.constant 0 : index
      %17 = vector.load %arg4[%c0_13, %c0_14] : memref<32x2xf32, #tpu.memory_space<vmem>>, vector<32x2xf32>
      %cst_15 = arith.constant dense<0.000000e+00> : vector<2x2xf32>
      %18 = tpu.matmul %16, %17, %cst_15 {dimension_numbers = #tpu.dot_dimension_numbers<[1], [0], [0], [1], [0, 0, 1, 1], [], []>} : vector<2x32xf32>, vector<32x2xf32>, vector<2x2xf32> -> vector<2x2xf32>
      %c0_16 = arith.constant 0 : index
      %c0_17 = arith.constant 0 : index
      %19 = vector.load %arg5[%c0_16, %c0_17] : memref<1x2xf32, #tpu.memory_space<vmem>>, vector<1x2xf32>
      %20 = vector.broadcast %19 : vector<1x2xf32> to vector<2x2xf32>
      %21 = arith.addf %18, %20 : vector<2x2xf32>
      %c0_18 = arith.constant 0 : index
      %c0_19 = arith.constant 0 : index
      %22 = vector.load %arg6[%c0_18, %c0_19] : memref<2x2xf32, #tpu.memory_space<vmem>>, vector<2x2xf32>
      tpu.vector_store %arg6[%c0_18, %c0_19], %21 {strides = array<i32>} : memref<2x2xf32, #tpu.memory_space<vmem>>, vector<2x2xf32>,
    } else {
    }
    return
  }
  func.func @transform_0(%arg0: i32, %arg1: i32) -> (i32, i32, i32) {
    %c0_i32 = arith.constant 0 : i32
    %c0_i32_0 = arith.constant 0 : i32
    return %arg0, %arg1, %c0_i32 : i32, i32, i32
  }
  func.func @transform_1(%arg0: i32, %arg1: i32) -> (i32, i32) {
    %c0_i32 = arith.constant 0 : i32
    %c0_i32_0 = arith.constant 0 : i32
    return %arg0, %c0_i32 : i32, i32
  }
  func.func @transform_2(%arg0: i32, %arg1: i32) -> (i32, i32) {
    %c0_i32 = arith.constant 0 : i32
    %c0_i32_0 = arith.constant 0 : i32
    %c0_i32_1 = arith.constant 0 : i32
    return %c0_i32, %c0_i32_0 : i32, i32
  }
  func.func @transform_3(%arg0: i32, %arg1: i32) -> (i32, i32) {
    %c0_i32 = arith.constant 0 : i32
    %c0_i32_0 = arith.constant 0 : i32
    %c0_i32_1 = arith.constant 0 : i32
    return %c0_i32, %c0_i32_0 : i32, i32
  }
  func.func @transform_4(%arg0: i32, %arg1: i32) -> (i32, i32) {
    %c0_i32 = arith.constant 0 : i32
    %c0_i32_0 = arith.constant 0 : i32
    return %arg0, %c0_i32 : i32, i32
  }
}

</mosaic_0001>

<bundles_post_ra>
// kernel: tpu_custom_call.1
= control target key start
LH: loop header
LB: loop body
LE: loop exit
PB: predicated region body
PF: predicated region fallthrough
CT: control target
= control target key end

     0   :  { %vm22_vm0 = vcmask 254976   ;;  %v306_v2 = vmov 0   ;;  %v307_v3 = vmov 0.0   ;;  %vm57_vm1 = vcmask 261120   ;;  %s399_s0 = inlined_call_operand.vmem [shape: bf16[2,64,32], index: 0, kind: input, shape index: {}]   ;;  %s400_s1 = inlined_call_operand.vmem [shape: f32[2,1], index: 1, kind: input, shape index: {}]   ;;  %s401_s2 = inlined_call_operand.vmem [shape: f32[32,2], index: 2, kind: input, shape index: {}]   ;;  %s402_s3 = inlined_call_operand.vmem [shape: f32[1,2], index: 3, kind: input, shape index: {}]   ;;  %s403_s4 = inlined_call_operand.hbm [shape: f32[2,2], index: 4, kind: output, shape index: {}]  }
   0x1   :  { %v112_v0 = vld [vmem:[%s400_s1] sm:$0x3]  ;;  %281 = vset.pattern.permute.xlu0 %v306_v2  ;;  %23 = vst.msk [vmem:[#allocation2] sm:$0x3] %vm22_vm0, %v307_v3  ;;  %v254_v6 = vld [vmem:[%s399_s0 + $0x8] sm:$0xff]   ;;  %266 = vmatprep.subr.mxu0 %v307_v3  ;;  %v255_v8 = vld [vmem:[%s399_s0 + $0x10] sm:$0xff]  }
   0x2   :  { %v223_v1 = vld [vmem:[%s399_s0] sm:$0xff]   ;;  %282 = vrcp.f32 %v112_v0  ;;  %v228_v7 = vunpack.c.l.bf16 %v254_v6  ;;  %v258_v10 = vld [vmem:[%s399_s0 + $0x28] sm:$0xff]   ;;  %v229_v11 = vunpack.c.h.bf16 %v254_v6  ;;  %v123_v13 = vld [vmem:[%s401_s2 + $0x18] sm:$0xff] }
   0x3   :  { %v224_v4 = vunpack.c.l.bf16 %v223_v1  ;;  %v225_v5 = vunpack.c.h.bf16 %v223_v1  ;;  %v257_v9 = vld [vmem:[%s399_s0 + $0x20] sm:$0xff]   ;;  %v122_v14 = vld [vmem:[%s401_s2 + $0x10] sm:$0xff]  ;;  %v244_v16 = vunpack.c.l.bf16 %v258_v10  ;;  %267 = vmatpush3.msra.mxu0 %v123_v13 }
   0x4   :  { %v240_v12 = vunpack.c.l.bf16 %v257_v9  ;;  %v241_v15 = vunpack.c.h.bf16 %v257_v9 }
   0x5   :  { %9 = vsyncpa [#allocation4], 0  ;;  %v232_v17 = vunpack.c.l.bf16 %v255_v8  ;;  %v259_v18 = vld [vmem:[%s399_s0 + $0x30] sm:$0xff]   ;;  %v58_v19 = vsel %vm57_vm1, %v224_v4, 0.0  ;;  %v59_v20 = vsel %vm57_vm1, %v225_v5, 0.0  ;;  %268 = vmatprep.subr.mxu0 %v307_v3  ;;  %v256_v21 = vld [vmem:[%s399_s0 + $0x18] sm:$0xff]   ;;  %v245_v22 = vunpack.c.h.bf16 %v258_v10 }
   0x6   :  { %v60_v23 = vadd.f32 %v59_v20, %v58_v19  ;;  %v61_v24 = vsel %vm57_vm1, %v228_v7, 0.0  ;;  %269 = vmatpush3.msra.mxu0 %v122_v14  ;;  %v233_v25 = vunpack.c.h.bf16 %v255_v8  ;;  %v63_v26 = vsel %vm57_vm1, %v229_v11, 0.0  ;;  %v260_v33 = vld [vmem:[%s399_s0 + $0x38] sm:$0xff]   ;;  %v121_v36 = vld [vmem:[%s401_s2 + $0x8] sm:$0xff]  ;;  %v120_v43 = vld [vmem:[%s401_s2] sm:$0xff]  ;;  %s309_s14 = smov [#allocation3]  }
   0x7   :  { %v79_v27 = vsel %vm57_vm1, %v240_v12, 0.0  ;;  %270 = vmatprep.subr.mxu0 %v307_v3  ;;  %v248_v28 = vunpack.c.l.bf16 %v259_v18  ;;  %v80_v30 = vsel %vm57_vm1, %v241_v15, 0.0  ;;  %v82_v31 = vsel %vm57_vm1, %v244_v16, 0.0  ;;  %v220_v16 = vld [vmem:[%s402_s3] ss:$0 sm:$0xff]  ;;  %s212_s15 = sshll.u32 %s309_s14, 4  ;;  %s213_s15 = int_to_ptr.vmem [resolvable:$true] %s212_s15 }
   0x8   :  { %v62_v29 = vadd.f32 %v61_v24, %v60_v23  ;;  %v236_v32 = vunpack.c.l.bf16 %v256_v21  ;;  %v65_v34 = vsel %vm57_vm1, %v232_v17, 0.0  ;;  %v81_v35 = vadd.f32 %v80_v30, %v79_v27  ;;  %271 = vmatpush3.msra.mxu0 %v121_v36  ;;  %v40_v9 = vld [vmem:[#allocation2] sm:$0x3]  ;;  %s284_s16 = scalar_lea.vmem %s213_s15, 32  ;;  %p289_p1 = scmp.lt.s32.totalorder %s213_s15, %s213_s15 }
   0x9   :  { %v249_v37 = vunpack.c.h.bf16 %v259_v18  ;;  %v84_v39 = vsel %vm57_vm1, %v245_v22, 0.0  ;;  %v237_v40 = vunpack.c.h.bf16 %v256_v21  ;;  %v67_v41 = vsel %vm57_vm1, %v233_v25, 0.0  ;;  %272 = vmatprep.subr.mxu0 %v307_v3  ;;  %p285_p0 = scmp.ne.s32.totalorder %s213_s15, %s284_s16  ;;  %p290_p2 = scmp.lt.s32.totalorder %s284_s16, %s284_s16 }
   0xa   :  { %v64_v38 = vadd.f32 %v63_v26, %v62_v29  ;;  %v83_v42 = vadd.f32 %v82_v31, %v81_v35  ;;  %v252_v44 = vunpack.c.l.bf16 %v260_v33  ;;  %v86_v46 = vsel %vm57_vm1, %v248_v28, 0.0  ;;  %273 = vmatpush3.msra.mxu0 %v120_v43 }
   0xb   :  { %vm308_vm2 = vmmov 0   ;;  %v69_v47 = vsel %vm57_vm1, %v236_v32, 0.0  ;;  %v253_v50 = vunpack.c.h.bf16 %v260_v33  ;;  %v88_v52 = vsel %vm57_vm1, %v249_v37, 0.0  ;;  %p291_p3 = por %p290_p2, %p289_p1 }
   0xc   :  { %v66_v45 = vadd.f32 %v65_v34, %v64_v38  ;;  %274 = vmatprep.mubr.msk.f32.mxu0 %vm308_vm2, %v307_v3  ;;  %v85_v48 = vadd.f32 %v84_v39, %v83_v42  ;;  %v71_v53 = vsel %vm57_vm1, %v237_v40, 0.0  ;;  %v90_v56 = vsel %vm57_vm1, %v252_v44, 0.0 }
   0xd   :  { %v92_v59 = vsel %vm57_vm1, %v253_v50, 0.0  ;;  %vm102_vm3 = vcmask 1041409   ;;  %vm204_vm4 = vcmask 9216   ;;  %p292_p4 = pnand %p291_p3, %p285_p0 }
   0xe   :  { %v68_v51 = vadd.f32 %v67_v41, %v66_v45  ;;  %v87_v54 = vadd.f32 %v86_v46, %v85_v48 }
   0xf   :  { %v283_v49 = vpop.eup %282 }
  0x10   :  { %116 = vperm.xlu0 %281, %v283_v49   ;;  %v70_v55 = vadd.f32 %v69_v47, %v68_v51  ;;  %v89_v57 = vadd.f32 %v88_v52, %v87_v54 }
  0x12   :  { %v72_v58 = vadd.f32 %v71_v53, %v70_v55  ;;  %v91_v60 = vadd.f32 %v90_v56, %v89_v57 }
  0x14   :  { %v73_v61 = vrot.slane %v72_v58, 4  ;;  %v93_v62 = vadd.f32 %v92_v59, %v91_v60 }
  0x16   :  { %v74_v63 = vadd.f32 %v73_v61, %v72_v58  ;;  %v94_v0 = vrot.slane %v93_v62, 4 }
  0x18   :  { %v75_v1 = vrot.slane %v74_v63, 2  ;;  %v95_v2 = vadd.f32 %v94_v0, %v93_v62 }
  0x1a   :  { %v76_v3 = vadd.f32 %v75_v1, %v74_v63  ;;  %v96_v4 = vrot.slane %v95_v2, 2 }
  0x1c   :  { %v77_v5 = vrot.slane %v76_v3, 1  ;;  %v97_v6 = vadd.f32 %v96_v4, %v95_v2 }
  0x1e   :  { %v78_v7 = vadd.f32 %v77_v5, %v76_v3  ;;  %v98_v8 = vrot.slane %v97_v6, 1 }
  0x20   :  { %v99_v10 = vadd.f32 %v98_v8, %v97_v6 }
  0x22   :  { %v103_v11 = vsel %vm102_vm3, %v99_v10, %v78_v7 }
  0x23   :  { %v105_v12 = vadd.f32 %v103_v11, %v40_v9 }
  0x25   :  { %107 = vst.msk [vmem:[#allocation2] sm:$0x3] %vm22_vm0, %v105_v12 }
  0x2c   :  { %v111_v13 = vld [vmem:[#allocation2] sm:$0x3] }
  0x8b   :  { %v117_v14 = vpop.permute.xlu0 %116 }
  0x8c   :  { %v119_v15 = vmul.f32 %v117_v14, %v111_v13 }
  0x8e   :  { %275 = vmatmul.mubr.msk.f32.vlgmr.msra.gmra.mxu0 %vm57_vm1, %v119_v15 }
 0x14e   :  { %v200_v17 = vpop.f32.mrf.mxu0 }
 0x14f   :  { %v201_v18 = vadd.f32 %v220_v16, %v200_v17 }
 0x150   :  { %v276_v19 = vpop.f32.mrf.mxu0 }
 0x151   :  { %205 = vst.msk [vmem:[#allocation3] sm:$0x3] %vm204_vm4, %v201_v18 }
 0x152   :  { %295 = shalt.err (!%p292_p4)
}
 0x153   :  { %215 = dma.vmem_to_hbm [thread:$0]  %s213_s15, 32, %s403_s4, [#allocation4]  }
 0x154   :  { %304 = dma.done.wait [#allocation4], 32  }
 0x155   :  { %305 = vsyncadd [#allocation4], 4294967264 }
 0x156   :  { %219 = vsyncpa [#allocation4], 1 }

</bundles_post_ra>
